<compile_context>
chip_gen: v5e
topology: v5e:2x2
jax: 0.10.0
libtpu: 0.0.40
codegen_flags: <defaults>
</compile_context>

<pallas_src>
import functools
import math

import jax
import jax.numpy as jnp
from jax.experimental import pallas as pl
from jax.experimental.pallas import tpu as pltpu

GROUP_NUM = 16
GATE_THRESHOLD = 0.5
EPS = 1e-10
LANE = 128


def _round_up(x, m):
    return ((x + m - 1) // m) * m


def _tpu_info():
    """Best-effort (vmem_capacity_bytes, default_scoped_vmem_bytes, num_tensorcores)."""
    kind = ""
    try:
        kind = jax.devices()[0].device_kind.lower()
    except Exception:
        pass
    if "v2" in kind or "v3" in kind:
        cap_guess = 16 << 20
    elif "7" in kind:                 # v7x: 64 MiB per TensorCore
        cap_guess = 64 << 20
    else:                             # v5e / v5p / v6e: 128 MiB
        cap_guess = 128 << 20
    vmem_cap = cap_guess
    try:
        info = pltpu.get_tpu_info()
        for attr in ("vmem_capacity_bytes", "vmem_size_bytes", "vmem_bytes"):
            v = getattr(info, attr, None)
            if v:
                vmem_cap = min(int(v), cap_guess)   # be conservative if they disagree
                break
    except Exception:
        pass
    default_scoped = (16 << 20) if ("v5 lite" in kind or "v5e" in kind
                                    or vmem_cap <= (32 << 20)) else (32 << 20)
    two_core = ("7" in kind or "v4" in kind or "v5p" in kind
                or kind.rstrip().endswith("v5"))
    return vmem_cap, default_scoped, (2 if two_core else 1)


def _plan_tiling(n, c2, hw, cpg, itemsize, vmem_cap, num_tc,
                 batch_block=None, channel_block_groups=None):
    """Pick (NB images, CB channels-per-half) per grid step + a VMEM estimate."""
    hwp = _round_up(hw, LANE)                      # lanes actually occupied in VMEM
    sub = {4: 8, 2: 16, 1: 32}.get(itemsize, 8)    # sublane pack of the io dtype

    def step_bytes(nb, cb):
        elems = nb * 2 * cb * hwp
        # in + out double-buffered in the native dtype, plus ~5 f32 full-tile
        # temporaries (xc, gn, x1, x2, output cast) live inside the kernel.
        return 4 * elems * itemsize + 5 * elems * 4

    budget = int(vmem_cap * 0.55)
    target_in = (2 << 20) if vmem_cap <= (64 << 20) else (6 << 20)

    # --- channels-per-half per block: whole groups, sublane aligned, divisor of c2 ---
    if channel_block_groups is not None:
        cb = channel_block_groups * cpg
        assert c2 % cb == 0 and (cb % sub == 0 or cb == c2), "bad channel block"
    else:
        cb = c2
        if step_bytes(1, c2) > budget:             # a single image over budget -> tile channels
            quantum = cpg * sub // math.gcd(cpg, sub)          # lcm(cpg, sublane pack)
            cands = [d for d in range(quantum, c2, quantum) if c2 % d == 0]
            for d in sorted(cands, reverse=True):
                if step_bytes(1, d) <= budget:
                    cb = d
                    break
            else:
                if cands:
                    cb = cands[0]                  # smallest legal block; best effort

    # --- images per block ---
    if batch_block is not None:
        nb = max(1, min(n, batch_block))
    else:
        per_image_in = 2 * cb * hwp * itemsize
        nb = max(1, min(n, target_in // max(per_image_in, 1)))
        while nb > 1 and step_bytes(nb, cb) > budget:
            nb -= 1
        if num_tc > 1 and n > 1 and cb == c2:
            # Two TensorCores share the parallel grid: keep >= 2 and preferably an
            # even number of batch steps so neither core idles.
            nb = min(nb, pl.cdiv(n, 2))
            if pl.cdiv(n, nb) % 2:
                for cand in range(nb, 0, -1):
                    if pl.cdiv(n, cand) % 2 == 0:
                        nb = cand
                        break
    return nb, cb, step_bytes(nb, cb)


def _sru_kernel(x_ref, p_ref, w_ref, b_ref, wg_ref, o_ref, *, n_valid, logit_t, eps):
    # Blocks: x_ref / o_ref : (NB, 2, CB, HW)  (two channel halves, CB whole groups)
    #         p_ref         : (CB, CB)         group reduce/broadcast matrix
    #         w_ref / b_ref / wg_ref : (2, CB, 1)
    P = p_ref[...]
    inv_n = jnp.float32(1.0 / n_valid)
    inv_nm1 = jnp.float32(1.0 / (n_valid - 1))     # torch.std default: unbiased
    thr = jnp.float32(logit_t)

    def norm_and_gate(h):
        xh = x_ref[:, h, :, :]                                        # native dtype
        # pass 1: per-channel sums (f32 accumulation) -> per-group mean per channel.
        s = jnp.sum(xh, axis=-1, dtype=jnp.float32)                   # (NB, CB)
        mean = jnp.dot(s, P, preferred_element_type=jnp.float32) * inv_n
        # pass 2: centered sum of squares (no E[x^2]-mean^2 cancellation); the f32
        # cast fuses into the subtract, no materialized f32 copy of x.
        xc = xh.astype(jnp.float32) - mean[..., None]                 # (NB, CB, HW)
        css = jnp.sum(xc * xc, axis=-1)                               # (NB, CB)
        gcss = jnp.dot(css, P, preferred_element_type=jnp.float32)
        std = jnp.sqrt(gcss * inv_nm1)
        inv_std = pl.reciprocal(std + jnp.float32(eps))               # tiny (NB, CB)
        w = w_ref[h, :, :]                                            # (CB, 1)
        scale = w * inv_std[..., None]                                # (NB, CB, 1)
        gn = xc * scale + b_ref[h, :, :]                              # fused affine GN
        # gate: sigmoid(gn * w_gamma) >= t  <=>  gn * w_gamma >= logit(t)  (monotone)
        info = (gn * wg_ref[h, :, :]) >= thr
        x1 = jnp.where(info, gn, 0.0)                                 # informative part
        x2 = gn - x1                                                  # exact complement
        return x1, x2

    x1a, x2a = norm_and_gate(0)
    x1b, x2b = norm_and_gate(1)
    # Reconstruct: cross-add the two halves; each store is a full lane/sublane
    # aligned (NB, CB, HW) slab (the split sits on a leading dim, never mid-tile).
    o_ref[:, 0, :, :] = (x1a + x2b).astype(o_ref.dtype)
    o_ref[:, 1, :, :] = (x1b + x2a).astype(o_ref.dtype)


def sru_forward(x_nchw, weight, bias, group_num=GROUP_NUM,
                gate_threshold=GATE_THRESHOLD, eps=EPS,
                batch_block=None, channel_block_groups=None):
    # TODO(synk): the torch_gn=True (nn.GroupNorm) variant is not implemented; this
    # is the module-default GroupBatchnorm2d path.
    N, C, H, W = x_nchw.shape
    assert C >= group_num and C % group_num == 0, "C must be a multiple of group_num"
    assert C % 2 == 0, "reconstruct splits the channel dim in half"
    # TODO(synk): odd group_num (a group straddling the half boundary) would need a
    # joint-half group reduce; only even group_num (module default 16) is supported.
    assert group_num % 2 == 0, "group_num must be even"
    cpg = C // group_num
    HW = H * W
    assert cpg * HW > 1, "torch.std(ddof=1) is undefined for single-element groups"
    C2 = C // 2

    # Pure metadata reshapes (no HBM copies): split channels into the two halves the
    # reconstruct cross-adds; group boundaries stay inside a half (group_num even).
    x = x_nchw.reshape(N, 2, C2, HW)
    w2 = weight.reshape(2, C2, 1).astype(jnp.float32)
    b2 = bias.reshape(2, C2, 1).astype(jnp.float32)
    wg = w2 / jnp.sum(w2)                          # hoisted w_gamma = w / sum(w)

    vmem_cap, default_scoped, num_tc = _tpu_info()
    NB, CB, est_vmem = _plan_tiling(N, C2, HW, cpg, x.dtype.itemsize, vmem_cap,
                                    num_tc, batch_block, channel_block_groups)

    # Group reduce/broadcast matrix for one channel block (identical for every block
    # because blocks hold whole groups): P[c, d] = 1 iff channels c, d share a group.
    gid = jnp.arange(CB, dtype=jnp.int32) // cpg
    P = (gid[:, None] == gid[None, :]).astype(jnp.float32)

    grid = (pl.cdiv(N, NB), C2 // CB)              # ragged last batch block is fine
    logit_t = float(math.log(gate_threshold / (1.0 - gate_threshold)))  # 0.0 at t=0.5

    kernel = functools.partial(_sru_kernel, n_valid=cpg * HW, logit_t=logit_t, eps=eps)

    cparams = dict(dimension_semantics=("parallel", "parallel"))
    cap_limit = int(vmem_cap * 0.70)               # headroom for DMA queues / scratch
    if est_vmem + (2 << 20) > default_scoped:
        cparams["vmem_limit_bytes"] = int(min(cap_limit,
                                              max(default_scoped, est_vmem + (2 << 20))))

    out = pl.pallas_call(
        kernel,
        out_shape=jax.ShapeDtypeStruct((N, 2, C2, HW), x.dtype),
        grid_spec=pltpu.PrefetchScalarGridSpec(
            num_scalar_prefetch=0,
            grid=grid,
            in_specs=[
                pl.BlockSpec((NB, 2, CB, HW), lambda i, j: (i, 0, j, 0)),  # x
                pl.BlockSpec((CB, CB), lambda i, j: (0, 0)),               # P (invariant)
                pl.BlockSpec((2, CB, 1), lambda i, j: (0, j, 0)),          # weight
                pl.BlockSpec((2, CB, 1), lambda i, j: (0, j, 0)),          # bias
                pl.BlockSpec((2, CB, 1), lambda i, j: (0, j, 0)),          # w_gamma
            ],
            out_specs=pl.BlockSpec((NB, 2, CB, HW), lambda i, j: (i, 0, j, 0)),
        ),
        compiler_params=pltpu.CompilerParams(**cparams),
    )(x, P, w2, b2, wg)

    return out.reshape(N, C, H, W)


def sru_reference(x, weight, bias, group_num=GROUP_NUM,
                  gate_threshold=GATE_THRESHOLD, eps=EPS):
    """Pure-JAX reference matching the PyTorch forward."""
    N, C, H, W = x.shape
    xg = x.reshape(N, group_num, -1)
    mean = xg.mean(axis=2, keepdims=True)
    std = jnp.std(xg, axis=2, keepdims=True, ddof=1)         # torch.std is unbiased
    xg = (xg - mean) / (std + eps)
    xn = xg.reshape(N, C, H, W)
    gn_x = xn * weight.reshape(1, C, 1, 1) + bias.reshape(1, C, 1, 1)
    w_gamma = (weight / jnp.sum(weight)).reshape(1, C, 1, 1)
    rew = jax.nn.sigmoid(gn_x * w_gamma)
    info = rew >= gate_threshold
    x1 = jnp.where(info, gn_x, 0.0)
    x2 = jnp.where(info, 0.0, gn_x)
    half = C // 2
    return jnp.concatenate([x1[:, :half] + x2[:, half:],
                            x1[:, half:] + x2[:, :half]], axis=1)


if __name__ == "__main__":
    key = jax.random.PRNGKey(0)
    k_x, k_w, k_x2, k_w2, k_b2 = jax.random.split(key, 5)

    # Case 1: module-default small shapes (oup_channels=32 >= group_num=16), HW=256.
    N, C, H, W = 2, 32, 16, 16
    x = jax.random.normal(k_x, (N, C, H, W), dtype=jnp.float32)
    weight = jax.random.normal(k_w, (C, 1, 1), dtype=jnp.float32)   # randn, like the module
    bias = jnp.zeros((C, 1, 1), dtype=jnp.float32)

    out = jax.block_until_ready(sru_forward(x, weight, bias))
    ref = sru_reference(x, weight, bias)
    assert out.shape == (N, C, H, W)
    assert jnp.allclose(out, ref, rtol=1e-3, atol=1e-3), \
        float(jnp.max(jnp.abs(out - ref)))

    # Case 2: exercise the no-pad path (HW=100, not a multiple of 128), a ragged last
    # batch block (N=3 with 2 images per step) and group-pair channel tiling (CB=8).
    N2, H2, W2 = 3, 10, 10
    x_b = jax.random.normal(k_x2, (N2, C, H2, W2), dtype=jnp.float32)
    w_b = jax.random.normal(k_w2, (C, 1, 1), dtype=jnp.float32)
    b_b = 0.1 * jax.random.normal(k_b2, (C, 1, 1), dtype=jnp.float32)
    out_b = jax.block_until_ready(
        sru_forward(x_b, w_b, b_b, batch_block=2, channel_block_groups=4))
    ref_b = sru_reference(x_b, w_b, b_b)
    assert out_b.shape == (N2, C, H2, W2)
    assert jnp.allclose(out_b, ref_b, rtol=1e-3, atol=1e-3), \
        float(jnp.max(jnp.abs(out_b - ref_b)))

    print("KERNEL_OK")
</pallas_src>

<mosaic_0001>
module attributes {stable_mosaic.version = 11 : i64} {
  func.func @_sru_kernel(%arg0: i32, %arg1: i32, %arg2: memref<2x2x16x256xf32, #tpu.memory_space<vmem>>, %arg3: memref<16x16xf32, #tpu.memory_space<vmem>>, %arg4: memref<2x16x1xf32, #tpu.memory_space<vmem>>, %arg5: memref<2x16x1xf32, #tpu.memory_space<vmem>>, %arg6: memref<2x16x1xf32, #tpu.memory_space<vmem>>, %arg7: memref<2x2x16x256xf32, #tpu.memory_space<vmem>>) attributes {dimension_semantics = [#tpu.dimension_semantics<parallel>, #tpu.dimension_semantics<parallel>], iteration_bounds = array<i64: 1, 1>, scalar_prefetch = 0 : i64, scratch_operands = 0 : i64, tpu.core_type = #tpu.core_type<tc>, window_params = [{transform_indices = @transform_0, window_bounds = array<i64: 2, 2, 16, 256>}, {pipeline_mode = #tpu.pipeline_mode<synchronous>, transform_indices = @transform_1, window_bounds = array<i64: 16, 16>}, {transform_indices = @transform_2, window_bounds = array<i64: 2, 16, 1>}, {transform_indices = @transform_3, window_bounds = array<i64: 2, 16, 1>}, {transform_indices = @transform_4, window_bounds = array<i64: 2, 16, 1>}, {transform_indices = @transform_5, window_bounds = array<i64: 2, 2, 16, 256>}]} {
    %c0 = arith.constant 0 : index
    %c0_0 = arith.constant 0 : index
    %0 = vector.load %arg3[%c0, %c0_0] : memref<16x16xf32, #tpu.memory_space<vmem>>, vector<16x16xf32>
    %c0_1 = arith.constant 0 : index
    %c0_2 = arith.constant 0 : index
    %c0_3 = arith.constant 0 : index
    %c0_4 = arith.constant 0 : index
    %1 = vector.load %arg2[%c0_1, %c0_2, %c0_3, %c0_4] : memref<2x2x16x256xf32, #tpu.memory_space<vmem>>, vector<2x1x16x256xf32>
    %2 = vector.shape_cast %1 : vector<2x1x16x256xf32> to vector<2x16x256xf32>
    %cst = arith.constant dense<0.000000e+00> : vector<2x16xf32>
    %3 = vector.multi_reduction <add>, %2, %cst [2] : vector<2x16x256xf32> to vector<2x16xf32>
    %cst_5 = arith.constant dense<0.000000e+00> : vector<2x16xf32>
    %4 = tpu.matmul %3, %0, %cst_5 {dimension_numbers = #tpu.dot_dimension_numbers<[1], [0], [0], [1], [0, 0, 1, 1], [], []>} : vector<2x16xf32>, vector<16x16xf32>, vector<2x16xf32> -> vector<2x16xf32>
    %cst_6 = arith.constant 0.001953125 : f32
    %5 = vector.broadcast %cst_6 : f32 to vector<2x16xf32>
    %6 = arith.mulf %4, %5 : vector<2x16xf32>
    %7 = vector.shape_cast %6 : vector<2x16xf32> to vector<2x16x1xf32>
    %8 = vector.broadcast %7 : vector<2x16x1xf32> to vector<2x16x256xf32>
    %9 = arith.subf %2, %8 : vector<2x16x256xf32>
    %10 = arith.mulf %9, %9 : vector<2x16x256xf32>
    %cst_7 = arith.constant dense<0.000000e+00> : vector<2x16xf32>
    %11 = vector.multi_reduction <add>, %10, %cst_7 [2] : vector<2x16x256xf32> to vector<2x16xf32>
    %cst_8 = arith.constant dense<0.000000e+00> : vector<2x16xf32>
    %12 = tpu.matmul %11, %0, %cst_8 {dimension_numbers = #tpu.dot_dimension_numbers<[1], [0], [0], [1], [0, 0, 1, 1], [], []>} : vector<2x16xf32>, vector<16x16xf32>, vector<2x16xf32> -> vector<2x16xf32>
    %cst_9 = arith.constant 0.00195694715 : f32
    %13 = vector.broadcast %cst_9 : f32 to vector<2x16xf32>
    %14 = arith.mulf %12, %13 : vector<2x16xf32>
    %15 = math.sqrt %14 : vector<2x16xf32>
    %cst_10 = arith.constant 1.000000e-10 : f32
    %16 = vector.broadcast %cst_10 : f32 to vector<2x16xf32>
    %17 = arith.addf %15, %16 : vector<2x16xf32>
    %18 = tpu.reciprocal %17 : vector<2x16xf32> -> vector<2x16xf32>
    %c0_11 = arith.constant 0 : index
    %c0_12 = arith.constant 0 : index
    %c0_13 = arith.constant 0 : index
    %19 = vector.load %arg4[%c0_11, %c0_12, %c0_13] : memref<2x16x1xf32, #tpu.memory_space<vmem>>, vector<1x16x1xf32>
    %20 = vector.shape_cast %19 : vector<1x16x1xf32> to vector<16x1xf32>
    %21 = vector.shape_cast %18 : vector<2x16xf32> to vector<2x16x1xf32>
    %22 = vector.shape_cast %20 : vector<16x1xf32> to vector<1x16x1xf32>
    %23 = vector.broadcast %22 : vector<1x16x1xf32> to vector<2x16x1xf32>
    %24 = arith.mulf %23, %21 : vector<2x16x1xf32>
    %25 = vector.broadcast %24 : vector<2x16x1xf32> to vector<2x16x256xf32>
    %26 = arith.mulf %9, %25 : vector<2x16x256xf32>
    %c0_14 = arith.constant 0 : index
    %c0_15 = arith.constant 0 : index
    %c0_16 = arith.constant 0 : index
    %27 = vector.load %arg5[%c0_14, %c0_15, %c0_16] : memref<2x16x1xf32, #tpu.memory_space<vmem>>, vector<1x16x1xf32>
    %28 = vector.shape_cast %27 : vector<1x16x1xf32> to vector<16x1xf32>
    %29 = vector.shape_cast %28 : vector<16x1xf32> to vector<1x16x1xf32>
    %30 = vector.broadcast %29 : vector<1x16x1xf32> to vector<2x16x256xf32>
    %31 = arith.addf %26, %30 : vector<2x16x256xf32>
    %c0_17 = arith.constant 0 : index
    %c0_18 = arith.constant 0 : index
    %c0_19 = arith.constant 0 : index
    %32 = vector.load %arg6[%c0_17, %c0_18, %c0_19] : memref<2x16x1xf32, #tpu.memory_space<vmem>>, vector<1x16x1xf32>
    %33 = vector.shape_cast %32 : vector<1x16x1xf32> to vector<16x1xf32>
    %34 = vector.shape_cast %33 : vector<16x1xf32> to vector<1x16x1xf32>
    %35 = vector.broadcast %34 : vector<1x16x1xf32> to vector<2x16x256xf32>
    %36 = arith.mulf %31, %35 : vector<2x16x256xf32>
    %cst_20 = arith.constant 0.000000e+00 : f32
    %37 = vector.broadcast %cst_20 : f32 to vector<2x16x256xf32>
    %38 = arith.cmpf oge, %36, %37 : vector<2x16x256xf32>
    %cst_21 = arith.constant 0.000000e+00 : f32
    %39 = vector.broadcast %cst_21 : f32 to vector<2x16x256xf32>
    %40 = arith.select %38, %31, %39 : vector<2x16x256xi1>, vector<2x16x256xf32>
    %41 = arith.subf %31, %40 : vector<2x16x256xf32>
    %c0_22 = arith.constant 0 : index
    %c1 = arith.constant 1 : index
    %c0_23 = arith.constant 0 : index
    %c0_24 = arith.constant 0 : index
    %42 = vector.load %arg2[%c0_22, %c1, %c0_23, %c0_24] : memref<2x2x16x256xf32, #tpu.memory_space<vmem>>, vector<2x1x16x256xf32>
    %43 = vector.shape_cast %42 : vector<2x1x16x256xf32> to vector<2x16x256xf32>
    %cst_25 = arith.constant dense<0.000000e+00> : vector<2x16xf32>
    %44 = vector.multi_reduction <add>, %43, %cst_25 [2] : vector<2x16x256xf32> to vector<2x16xf32>
    %cst_26 = arith.constant dense<0.000000e+00> : vector<2x16xf32>
    %45 = tpu.matmul %44, %0, %cst_26 {dimension_numbers = #tpu.dot_dimension_numbers<[1], [0], [0], [1], [0, 0, 1, 1], [], []>} : vector<2x16xf32>, vector<16x16xf32>, vector<2x16xf32> -> vector<2x16xf32>
    %cst_27 = arith.constant 0.001953125 : f32
    %46 = vector.broadcast %cst_27 : f32 to vector<2x16xf32>
    %47 = arith.mulf %45, %46 : vector<2x16xf32>
    %48 = vector.shape_cast %47 : vector<2x16xf32> to vector<2x16x1xf32>
    %49 = vector.broadcast %48 : vector<2x16x1xf32> to vector<2x16x256xf32>
    %50 = arith.subf %43, %49 : vector<2x16x256xf32>
    %51 = arith.mulf %50, %50 : vector<2x16x256xf32>
    %cst_28 = arith.constant dense<0.000000e+00> : vector<2x16xf32>
    %52 = vector.multi_reduction <add>, %51, %cst_28 [2] : vector<2x16x256xf32> to vector<2x16xf32>
    %cst_29 = arith.constant dense<0.000000e+00> : vector<2x16xf32>
    %53 = tpu.matmul %52, %0, %cst_29 {dimension_numbers = #tpu.dot_dimension_numbers<[1], [0], [0], [1], [0, 0, 1, 1], [], []>} : vector<2x16xf32>, vector<16x16xf32>, vector<2x16xf32> -> vector<2x16xf32>
    %cst_30 = arith.constant 0.00195694715 : f32
    %54 = vector.broadcast %cst_30 : f32 to vector<2x16xf32>
    %55 = arith.mulf %53, %54 : vector<2x16xf32>
    %56 = math.sqrt %55 : vector<2x16xf32>
    %cst_31 = arith.constant 1.000000e-10 : f32
    %57 = vector.broadcast %cst_31 : f32 to vector<2x16xf32>
    %58 = arith.addf %56, %57 : vector<2x16xf32>
    %59 = tpu.reciprocal %58 : vector<2x16xf32> -> vector<2x16xf32>
    %c1_32 = arith.constant 1 : index
    %c0_33 = arith.constant 0 : index
    %c0_34 = arith.constant 0 : index
    %60 = vector.load %arg4[%c1_32, %c0_33, %c0_34] : memref<2x16x1xf32, #tpu.memory_space<vmem>>, vector<1x16x1xf32>
    %61 = vector.shape_cast %60 : vector<1x16x1xf32> to vector<16x1xf32>
    %62 = vector.shape_cast %59 : vector<2x16xf32> to vector<2x16x1xf32>
    %63 = vector.shape_cast %61 : vector<16x1xf32> to vector<1x16x1xf32>
    %64 = vector.broadcast %63 : vector<1x16x1xf32> to vector<2x16x1xf32>
    %65 = arith.mulf %64, %62 : vector<2x16x1xf32>
    %66 = vector.broadcast %65 : vector<2x16x1xf32> to vector<2x16x256xf32>
    %67 = arith.mulf %50, %66 : vector<2x16x256xf32>
    %c1_35 = arith.constant 1 : index
    %c0_36 = arith.constant 0 : index
    %c0_37 = arith.constant 0 : index
    %68 = vector.load %arg5[%c1_35, %c0_36, %c0_37] : memref<2x16x1xf32, #tpu.memory_space<vmem>>, vector<1x16x1xf32>
    %69 = vector.shape_cast %68 : vector<1x16x1xf32> to vector<16x1xf32>
    %70 = vector.shape_cast %69 : vector<16x1xf32> to vector<1x16x1xf32>
    %71 = vector.broadcast %70 : vector<1x16x1xf32> to vector<2x16x256xf32>
    %72 = arith.addf %67, %71 : vector<2x16x256xf32>
    %c1_38 = arith.constant 1 : index
    %c0_39 = arith.constant 0 : index
    %c0_40 = arith.constant 0 : index
    %73 = vector.load %arg6[%c1_38, %c0_39, %c0_40] : memref<2x16x1xf32, #tpu.memory_space<vmem>>, vector<1x16x1xf32>
    %74 = vector.shape_cast %73 : vector<1x16x1xf32> to vector<16x1xf32>
    %75 = vector.shape_cast %74 : vector<16x1xf32> to vector<1x16x1xf32>
    %76 = vector.broadcast %75 : vector<1x16x1xf32> to vector<2x16x256xf32>
    %77 = arith.mulf %72, %76 : vector<2x16x256xf32>
    %cst_41 = arith.constant 0.000000e+00 : f32
    %78 = vector.broadcast %cst_41 : f32 to vector<2x16x256xf32>
    %79 = arith.cmpf oge, %77, %78 : vector<2x16x256xf32>
    %cst_42 = arith.constant 0.000000e+00 : f32
    %80 = vector.broadcast %cst_42 : f32 to vector<2x16x256xf32>
    %81 = arith.select %79, %72, %80 : vector<2x16x256xi1>, vector<2x16x256xf32>
    %82 = arith.subf %72, %81 : vector<2x16x256xf32>
    %83 = arith.addf %40, %82 : vector<2x16x256xf32>
    %c0_43 = arith.constant 0 : index
    %c0_44 = arith.constant 0 : index
    %c0_45 = arith.constant 0 : index
    %c0_46 = arith.constant 0 : index
    %84 = vector.load %arg7[%c0_43, %c0_44, %c0_45, %c0_46] : memref<2x2x16x256xf32, #tpu.memory_space<vmem>>, vector<2x1x16x256xf32>
    %85 = vector.shape_cast %84 : vector<2x1x16x256xf32> to vector<2x16x256xf32>
    %86 = vector.shape_cast %83 : vector<2x16x256xf32> to vector<2x1x16x256xf32>
    tpu.vector_store %arg7[%c0_43, %c0_44, %c0_45, %c0_46], %86 {strides = array<i32>} : memref<2x2x16x256xf32, #tpu.memory_space<vmem>>, vector<2x1x16x256xf32>,
    %87 = arith.addf %81, %41 : vector<2x16x256xf32>
    %c0_47 = arith.constant 0 : index
    %c1_48 = arith.constant 1 : index
    %c0_49 = arith.constant 0 : index
    %c0_50 = arith.constant 0 : index
    %88 = vector.load %arg7[%c0_47, %c1_48, %c0_49, %c0_50] : memref<2x2x16x256xf32, #tpu.memory_space<vmem>>, vector<2x1x16x256xf32>
    %89 = vector.shape_cast %88 : vector<2x1x16x256xf32> to vector<2x16x256xf32>
    %90 = vector.shape_cast %87 : vector<2x16x256xf32> to vector<2x1x16x256xf32>
    tpu.vector_store %arg7[%c0_47, %c1_48, %c0_49, %c0_50], %90 {strides = array<i32>} : memref<2x2x16x256xf32, #tpu.memory_space<vmem>>, vector<2x1x16x256xf32>,
    return
  }
  func.func @transform_0(%arg0: i32, %arg1: i32) -> (i32, i32, i32, i32) {
    %c0_i32 = arith.constant 0 : i32
    %c0_i32_0 = arith.constant 0 : i32
    %c0_i32_1 = arith.constant 0 : i32
    return %arg0, %c0_i32, %arg1, %c0_i32_0 : i32, i32, i32, i32
  }
  func.func @transform_1(%arg0: i32, %arg1: i32) -> (i32, i32) {
    %c0_i32 = arith.constant 0 : i32
    %c0_i32_0 = arith.constant 0 : i32
    %c0_i32_1 = arith.constant 0 : i32
    return %c0_i32, %c0_i32_0 : i32, i32
  }
  func.func @transform_2(%arg0: i32, %arg1: i32) -> (i32, i32, i32) {
    %c0_i32 = arith.constant 0 : i32
    %c0_i32_0 = arith.constant 0 : i32
    %c0_i32_1 = arith.constant 0 : i32
    return %c0_i32, %arg1, %c0_i32_0 : i32, i32, i32
  }
  func.func @transform_3(%arg0: i32, %arg1: i32) -> (i32, i32, i32) {
    %c0_i32 = arith.constant 0 : i32
    %c0_i32_0 = arith.constant 0 : i32
    %c0_i32_1 = arith.constant 0 : i32
    return %c0_i32, %arg1, %c0_i32_0 : i32, i32, i32
  }
  func.func @transform_4(%arg0: i32, %arg1: i32) -> (i32, i32, i32) {
    %c0_i32 = arith.constant 0 : i32
    %c0_i32_0 = arith.constant 0 : i32
    %c0_i32_1 = arith.constant 0 : i32
    return %c0_i32, %arg1, %c0_i32_0 : i32, i32, i32
  }
  func.func @transform_5(%arg0: i32, %arg1: i32) -> (i32, i32, i32, i32) {
    %c0_i32 = arith.constant 0 : i32
    %c0_i32_0 = arith.constant 0 : i32
    %c0_i32_1 = arith.constant 0 : i32
    return %arg0, %c0_i32, %arg1, %c0_i32_0 : i32, i32, i32, i32
  }
}

</mosaic_0001>

<bundles_post_ra>
// kernel: tpu_custom_call.1
= control target key start
LH: loop header
LB: loop body
LE: loop exit
PB: predicated region body
PF: predicated region fallthrough
CT: control target
= control target key end

     0   :  { %10 = vsyncpa [#allocation3], 0  ;;  %s1131_s0 = inlined_call_operand.hbm [shape: f32[2,2,16,256], index: 0, kind: input, shape index: {}]   ;;  %s1132_s1 = inlined_call_operand.vmem [shape: f32[16,16], index: 1, kind: input, shape index: {}]   ;;  %s1133_s2 = inlined_call_operand.vmem [shape: f32[2,16,1], index: 2, kind: input, shape index: {}]   ;;  %s1134_s3 = inlined_call_operand.vmem [shape: f32[2,16,1], index: 3, kind: input, shape index: {}]   ;;  %s1135_s4 = inlined_call_operand.vmem [shape: f32[2,16,1], index: 4, kind: input, shape index: {}]   ;;  %s1136_s5 = inlined_call_operand.hbm [shape: f32[2,2,16,256], index: 5, kind: output, shape index: {}]  }
   0x1   :  { %11 = vsyncpa [#allocation4], 0  ;;  %s16_s20 = sshll.u32 %s1131_s0, 4  ;;  %s780_s21 = smov [#allocation2]   ;;  %s17_s20 = int_to_ptr.hbm [resolvable:$true] %s16_s20 }
   0x2   :  { %s18_s22 = sshll.u32 %s780_s21, 4  ;;  %s781_s23 = smov 256   ;;  %s19_s22 = int_to_ptr.vmem [resolvable:$true] %s18_s22 }
   0x3   :  { %s782_s24 = smov 16  }
   0x4   :  { %24 = dma.hbm_to_vmem [thread:$0]  %s17_s20, 2048, %s19_s22, [#allocation3], %s781_s23, %s781_s23, %s782_s24  }
   0x5   :  { %776 = dma.done.wait [#allocation3], 2048  }
   0x6   :  { %777 = vsyncadd [#allocation3], 4294965248  ;;  %v63_v0 = vlaneseq  ;;  %v824_v2 = vld [vmem:[#allocation2 + $0x60] sm:$0xff]  ;;  %v826_v3 = vld [vmem:[#allocation2 + $0x68] sm:$0xff]  ;;  %vm68_vm0 = vcmask 130112   ;;  %vm73_vm1 = vcmask 1041409  }
   0x7   :  { %v828_v4 = vld [vmem:[#allocation2 + $0x20] sm:$0xff]  ;;  %v353_v5 = vadd.f32 %v826_v3, %v824_v2  ;;  %v832_v6 = vld [vmem:[#allocation2 + $0x28] sm:$0xff]  ;;  %v842_v11 = vld [vmem:[#allocation2 + $0x70] sm:$0xff]  ;;  %vm75_vm2 = vcmask 130048  }
   0x8   :  { %v821_v1 = vshrl.u32 %v63_v0, 7  ;;  %v834_v7 = vld [vmem:[#allocation2] sm:$0xff]  ;;  %v836_v8 = vld [vmem:[#allocation2 + $0x8] sm:$0xff]  ;;  %v347_v9 = vadd.f32 %v832_v6, %v828_v4  ;;  %v844_v12 = vld [vmem:[#allocation2 + $0x78] sm:$0xff]  ;;  %v883_v31 = vand.u32 127, %v63_v0 }
   0x9   :  { %v47_v10 = vadd.f32 %v836_v8, %v834_v7  ;;  %354 = vadd.xlane.f32.xlu1 %v353_v5  ;;  %v846_v13 = vld [vmem:[#allocation2 + $0x30] sm:$0xff]  ;;  %v848_v14 = vld [vmem:[#allocation2 + $0x38] sm:$0xff]  ;;  %v356_v17 = vadd.f32 %v844_v12, %v842_v11  ;;  %v864_v22 = vld [vmem:[#allocation2 + $0x40] sm:$0xff] }
   0xa   :  { %702 = vset.pattern.permute.xlu2 %v821_v1  ;;  %348 = vadd.xlane.f32.xlu0 %v347_v9  ;;  %v850_v15 = vld [vmem:[#allocation2 + $0x10] sm:$0xff]  ;;  %v852_v16 = vld [vmem:[#allocation2 + $0x18] sm:$0xff]  ;;  %v350_v18 = vadd.f32 %v848_v14, %v846_v13  ;;  %v866_v23 = vld [vmem:[#allocation2 + $0x48] sm:$0xff]  ;;  %v879_v28 = vadd.s32 8, %v821_v1  ;;  %v886_v33 = vadd.s32 4294967288, %v883_v31 }
   0xb   :  { %48 = vadd.xlane.f32.xlu2 %v47_v10  ;;  %v50_v19 = vadd.f32 %v852_v16, %v850_v15  ;;  %v860_v20 = vld [vmem:[#allocation2 + $0x50] sm:$0xff]  ;;  %v862_v21 = vld [vmem:[#allocation2 + $0x58] sm:$0xff]  ;;  %v53_v25 = vadd.f32 %v866_v23, %v864_v22  ;;  %v38_v26 = vld [vmem:[%s1132_s1 + $0x8] sm:$0xff] }
   0xc   :  { %v56_v24 = vadd.f32 %v862_v21, %v860_v20  ;;  %v37_v27 = vld [vmem:[%s1132_s1] sm:$0xff]  ;;  %386 = vmatpush.msra.mxu2 %v38_v26  ;;  %92 = vmatpush.msra.mxu0 %v38_v26  ;;  %s674_s1 = sshll.u32 %s1136_s5, 4  ;;  %s675_s1 = int_to_ptr.hbm [resolvable:$true] %s674_s1 }
   0xd   :  { %474 = vmatpush.msra.mxu3 %v38_v26  ;;  %180 = vmatpush.msra.mxu1 %v38_v26 }
   0xe   :  { %387 = vmatpush.msra.mxu2 %v37_v27  ;;  %93 = vmatpush.msra.mxu0 %v37_v27 }
   0xf   :  { %475 = vmatpush.msra.mxu3 %v37_v27  ;;  %181 = vmatpush.msra.mxu1 %v37_v27 }
  0x10   :  { %704 = vset.pattern.permute.xlu0 %v879_v28  ;;  %703 = vset.pattern.permute.xlu1 %v879_v28 }
  0x11   :  { %357 = vadd.xlane.f32.xlu1 %v356_v17 }
  0x12   :  { %351 = vadd.xlane.f32.xlu0 %v350_v18 }
  0x13   :  { %51 = vadd.xlane.f32.xlu2 %v50_v19 }
  0x19   :  { %57 = vadd.xlane.f32.xlu1 %v56_v24 }
  0x1a   :  { %54 = vadd.xlane.f32.xlu0 %v53_v25 }
  0x7c   :  { %v355_v29 = vpop.xlane.xlu1 %354 }
  0x7d   :  { %v349_v30 = vpop.xlane.xlu0 %348  ;;  %v366_v35 = vperm.slane %v355_v29, %v883_v31 }
  0x7e   :  { %v49_v32 = vpop.xlane.xlu2 %48  ;;  %v363_v38 = vperm.slane %v349_v30, %v883_v31 }
  0x7f   :  { %v65_v44 = vperm.slane %v49_v32, %v883_v31 }
  0x84   :  { %v358_v34 = vpop.xlane.xlu1 %357 }
  0x85   :  { %v367_v36 = vperm.slane %v358_v34, %v886_v33  ;;  %v352_v37 = vpop.xlane.xlu0 %351 }
  0x86   :  { %v364_v39 = vperm.slane %v352_v37, %v886_v33  ;;  %v52_v42 = vpop.xlane.xlu2 %51 }
  0x87   :  { %v368_v40 = vsel %vm68_vm0, %v367_v36, %v366_v35  ;;  %v67_v45 = vperm.slane %v52_v42, %v886_v33 }
  0x88   :  { %v365_v41 = vsel %vm68_vm0, %v364_v39, %v363_v38 }
  0x89   :  { %v369_v43 = vsel %vm73_vm1, %v368_v40, %v365_v41  ;;  %v69_v50 = vsel %vm68_vm0, %v67_v45, %v65_v44 }
  0x8a   :  { %689 = vmatmul.msk.f32.vlgmr.msra.gmra.mxu2 %vm75_vm2, %v369_v43 }
  0x8c   :  { %v58_v46 = vpop.xlane.xlu1 %57 }
  0x8d   :  { %v71_v47 = vperm.slane %v58_v46, %v886_v33  ;;  %v55_v48 = vpop.xlane.xlu0 %54 }
  0x8e   :  { %v70_v49 = vperm.slane %v55_v48, %v883_v31 }
  0x90   :  { %v72_v51 = vsel %vm68_vm0, %v71_v47, %v70_v49 }
  0x91   :  { %v74_v52 = vsel %vm73_vm1, %v72_v51, %v69_v50 }
  0x92   :  { %687 = vmatmul.msk.f32.vlgmr.msra.gmra.mxu0 %vm75_vm2, %v74_v52 }
 0x10d   :  { %v389_v53 = vpop.f32.mrf.mxu2 }
 0x10e   :  { %v392_v54 = vmul.f32 0.001953125, %v389_v53 }
 0x10f   :  { %v95_v55 = vpop.f32.mrf.mxu0 }
 0x110   :  { %v393_v56 = vperm.slane %v392_v54, 0  ;;  %v98_v57 = vmul.f32 0.001953125, %v95_v55  ;;  %v406_v59 = vperm.slane %v392_v54, 1 }
 0x112   :  { %v99_v58 = vperm.slane %v98_v57, 0  ;;  %404 = vperm.xlu0 %704, %v393_v56   ;;  %v112_v60 = vperm.slane %v98_v57, 1 }
 0x114   :  { %110 = vperm.xlu1 %703, %v99_v58   ;;  %104 = vperm.xlu2 %702, %v99_v58  }
 0x11a   :  { %713 = vset.pattern.permute.xlu0 %v821_v1 }
 0x11c   :  { %705 = vset.pattern.permute.xlu1 %v821_v1  ;;  %398 = vperm.xlu2 %702, %v393_v56  }
 0x124   :  { %411 = vperm.xlu1 %705, %v406_v59   ;;  %706 = vset.pattern.permute.xlu2 %v879_v28 }
 0x12c   :  { %708 = vset.pattern.permute.xlu1 %v879_v28  ;;  %417 = vperm.xlu2 %706, %v406_v59  }
 0x134   :  { %123 = vperm.xlu1 %708, %v112_v60   ;;  %707 = vset.pattern.permute.xlu2 %v821_v1 }
 0x13c   :  { %117 = vperm.xlu2 %707, %v112_v60  }
 0x16e   :  { %v105_v61 = vpop.permute.xlu2 %104 }
 0x16f   :  { %v910_v62 = vsub.f32 %v834_v7, %v105_v61  ;;  %v913_v63 = vsub.f32 %v836_v8, %v105_v61 }
 0x171   :  { %v133_v0 = vmul.f32 %v910_v62, %v910_v62  ;;  %v134_v5 = vmul.f32 %v913_v63, %v913_v63 }
 0x173   :  { %v141_v9 = vadd.f32 %v134_v5, %v133_v0 }
 0x175   :  { %142 = vadd.xlane.f32.xlu0 %v141_v9 }
 0x176   :  { %v399_v10 = vpop.permute.xlu2 %398 }
 0x177   :  { %v920_v17 = vsub.f32 %v828_v4, %v399_v10  ;;  %v923_v18 = vsub.f32 %v832_v6, %v399_v10 }
 0x179   :  { %v427_v7 = vmul.f32 %v920_v17, %v920_v17  ;;  %v428_v8 = vmul.f32 %v923_v18, %v923_v18 }
 0x17b   :  { %v435_v19 = vadd.f32 %v428_v8, %v427_v7 }
 0x17d   :  { %436 = vadd.xlane.f32.xlu0 %v435_v19 }
 0x184   :  { %v405_v24 = vpop.permute.xlu0 %404 }
 0x185   :  { %v930_v25 = vsub.f32 %v846_v13, %v405_v24  ;;  %v933_v26 = vsub.f32 %v848_v14, %v405_v24 }
 0x186   :  { %v418_v4 = vpop.permute.xlu2 %417  ;;  %v111_v13 = vpop.permute.xlu1 %110 }
 0x187   :  { %v429_v6 = vmul.f32 %v930_v25, %v930_v25  ;;  %v430_v27 = vmul.f32 %v933_v26, %v933_v26  ;;  %v940_v29 = vsub.f32 %v842_v11, %v418_v4  ;;  %v943_v30 = vsub.f32 %v844_v12, %v418_v4 }
 0x189   :  { %v438_v32 = vadd.f32 %v430_v27, %v429_v6  ;;  %v433_v14 = vmul.f32 %v940_v29, %v940_v29  ;;  %v434_v34 = vmul.f32 %v943_v30, %v943_v30  ;;  %v274_v6 = vld [vmem:[%s1134_s3] sm:$0xff] }
 0x18a   :  { %v294_v27 = vld [vmem:[%s1135_s4] sm:$0xff] }
 0x18b   :  { %439 = vadd.xlane.f32.xlu2 %v438_v32  ;;  %v444_v35 = vadd.f32 %v434_v34, %v433_v14  ;;  %v783_v32 = vmov 0  }
 0x18c   :  { %709 = vset.pattern.permute.xlu2 %v783_v32  ;;  %710 = vset.pattern.permute.xlu1 %v783_v32 }
 0x193   :  { %445 = vadd.xlane.f32.xlu2 %v444_v35 }
 0x196   :  { %v412_v36 = vpop.permute.xlu1 %411  ;;  %v118_v37 = vpop.permute.xlu2 %117 }
 0x197   :  { %v950_v38 = vsub.f32 %v824_v2, %v412_v36  ;;  %v953_v11 = vsub.f32 %v826_v3, %v412_v36  ;;  %v956_v12 = vsub.f32 %v864_v22, %v118_v37  ;;  %v959_v39 = vsub.f32 %v866_v23, %v118_v37 }
 0x198   :  { %v970_v3 = vsub.f32 %v850_v15, %v111_v13  ;;  %v973_v22 = vsub.f32 %v852_v16, %v111_v13  ;;  %v295_v13 = vld [vmem:[%s1135_s4 + $0x8] sm:$0xff] }
 0x199   :  { %v431_v40 = vmul.f32 %v950_v38, %v950_v38  ;;  %v432_v41 = vmul.f32 %v953_v11, %v953_v11  ;;  %v137_v42 = vmul.f32 %v956_v12, %v956_v12  ;;  %v138_v2 = vmul.f32 %v959_v39, %v959_v39 }
 0x19a   :  { %v135_v44 = vmul.f32 %v970_v3, %v970_v3  ;;  %v136_v45 = vmul.f32 %v973_v22, %v973_v22 }
 0x19b   :  { %v441_v23 = vadd.f32 %v432_v41, %v431_v40  ;;  %v147_v43 = vadd.f32 %v138_v2, %v137_v42 }
 0x19c   :  { %v144_v46 = vadd.f32 %v136_v45, %v135_v44 }
 0x19d   :  { %442 = vadd.xlane.f32.xlu1 %v441_v23  ;;  %148 = vadd.xlane.f32.xlu2 %v147_v43 }
 0x1a5   :  { %145 = vadd.xlane.f32.xlu1 %v144_v46 }
 0x1a6   :  { %v124_v47 = vpop.permute.xlu1 %123 }
 0x1a7   :  { %v980_v48 = vsub.f32 %v860_v20, %v124_v47  ;;  %v983_v15 = vsub.f32 %v862_v21, %v124_v47 }
 0x1a9   :  { %v139_v16 = vmul.f32 %v980_v48, %v980_v48  ;;  %v140_v49 = vmul.f32 %v983_v15, %v983_v15 }
 0x1ab   :  { %v150_v50 = vadd.f32 %v140_v49, %v139_v16 }
 0x1ad   :  { %151 = vadd.xlane.f32.xlu0 %v150_v50 }
 0x1b5   :  { %278 = vperm.xlu2 %709, %v274_v6  }
 0x1bd   :  { %303 = vperm.xlu2 %709, %v295_v13  }
 0x1be   :  { %298 = vperm.xlu1 %710, %v294_v27  }
 0x1c5   :  { %712 = vset.pattern.permute.xlu2 %v879_v28 }
 0x1c6   :  { %711 = vset.pattern.permute.xlu1 %v821_v1 }
 0x1e8   :  { %v143_v51 = vpop.xlane.xlu0 %142 }
 0x1e9   :  { %v157_v10 = vperm.slane %v143_v51, %v883_v31 }
 0x1f0   :  { %v437_v53 = vpop.xlane.xlu0 %436 }
 0x1f1   :  { %v451_v20 = vperm.slane %v437_v53, %v883_v31 }
 0x1fe   :  { %v440_v52 = vpop.xlane.xlu2 %439 }
 0x1ff   :  { %v452_v55 = vperm.slane %v440_v52, %v886_v33 }
 0x201   :  { %v453_v58 = vsel %vm68_vm0, %v452_v55, %v451_v20 }
 0x206   :  { %v446_v54 = vpop.xlane.xlu2 %445 }
 0x207   :  { %v455_v21 = vperm.slane %v446_v54, %v886_v33 }
 0x210   :  { %v443_v56 = vpop.xlane.xlu1 %442  ;;  %v149_v0 = vpop.xlane.xlu2 %148 }
 0x211   :  { %v454_v57 = vperm.slane %v443_v56, %v883_v31  ;;  %v160_v7 = vperm.slane %v149_v0, %v883_v31 }
 0x213   :  { %v456_v59 = vsel %vm68_vm0, %v455_v21, %v454_v57 }
 0x214   :  { %v457_v60 = vsel %vm73_vm1, %v456_v59, %v453_v58 }
 0x215   :  { %690 = vmatmul.msk.f32.vlgmr.msra.gmra.mxu3 %vm75_vm2, %v457_v60 }
 0x218   :  { %v146_v61 = vpop.xlane.xlu1 %145 }
 0x219   :  { %v158_v5 = vperm.slane %v146_v61, %v886_v33 }
 0x21b   :  { %v159_v19 = vsel %vm68_vm0, %v158_v5, %v157_v10 }
 0x220   :  { %v152_v9 = vpop.xlane.xlu0 %151 }
 0x221   :  { %v161_v8 = vperm.slane %v152_v9, %v886_v33 }
 0x223   :  { %v162_v24 = vsel %vm68_vm0, %v161_v8, %v160_v7 }
 0x224   :  { %v163_v4 = vsel %vm73_vm1, %v162_v24, %v159_v19 }
 0x225   :  { %688 = vmatmul.msk.f32.vlgmr.msra.gmra.mxu1 %vm75_vm2, %v163_v4 }
 0x298   :  { %v477_v31 = vpop.f32.mrf.mxu3 }
 0x299   :  { %v480_v33 = vmul.f32 0.0019569471, %v477_v31 }
 0x29b   :  { %720 = vrsqrt.f32 %v480_v33  ;;  %vm488_vm3 = vcmp.eq.f32.partialorder %v480_v33, inf  ;;  %v491_v44 = vand.u32 2147483648, %v480_v33  ;;  %vm490_vm4 = vcmp.eq.f32.partialorder %v480_v33, 0.0 }
 0x2a1   :  { %v721_v14 = vpop.eup %720 }
 0x2a2   :  { %v482_v34 = vmul.f32 %v721_v14, %v480_v33  ;;  %v183_v35 = vpop.f32.mrf.mxu1 }
 0x2a3   :  { %v186_v36 = vmul.f32 0.0019569471, %v183_v35 }
 0x2a4   :  { %v483_v37 = vmul.f32 %v721_v14, %v482_v34 }
 0x2a5   :  { %722 = vrsqrt.f32 %v186_v36  ;;  %vm194_vm5 = vcmp.eq.f32.partialorder %v186_v36, inf  ;;  %v197_v53 = vand.u32 2147483648, %v186_v36  ;;  %vm196_vm6 = vcmp.eq.f32.partialorder %v186_v36, 0.0 }
 0x2a6   :  { %v484_v40 = vmul.f32 0.5, %v483_v37  ;;  %v279_v37 = vpop.permute.xlu2 %278 }
 0x2a8   :  { %v485_v41 = vsub.f32 1.5, %v484_v40 }
 0x2aa   :  { %v486_v42 = vmul.f32 %v721_v14, %v485_v41  ;;  %v215_v41 = vld [vmem:[%s1133_s2 + $0x8] sm:$0xff] }
 0x2ab   :  { %v723_v2 = vpop.eup %722 }
 0x2ac   :  { %v487_v23 = vmul.f32 %v486_v42, %v480_v33  ;;  %v188_v43 = vmul.f32 %v723_v2, %v186_v36 }
 0x2ae   :  { %v189_v45 = vmul.f32 %v723_v2, %v188_v43  ;;  %v489_v46 = vsel %vm488_vm3, %v480_v33, %v487_v23  ;;  %v1027_v40 = vpop.permute.xlu2 %303 }
 0x2af   :  { %v492_v47 = vsel %vm490_vm4, %v491_v44, %v489_v46 }
 0x2b0   :  { %v190_v16 = vmul.f32 0.5, %v189_v45  ;;  %v493_v50 = vadd.f32 1e-10, %v492_v47  ;;  %v692_v47 = vld [vmem:[%s1133_s2 + $0x18] sm:$0xff] }
 0x2b2   :  { %v191_v49 = vsub.f32 1.5, %v190_v16  ;;  %724 = vrcp.f32 %v493_v50  ;;  %v505_v4 = vand.u32 2147483648, %v493_v50  ;;  %vm499_vm12 = vweird.f32 %v493_v50 }
 0x2b3   :  { %v503_v31 = vand.u32 2147483647, %v493_v50 }
 0x2b4   :  { %v192_v51 = vmul.f32 %v723_v2, %v191_v49  ;;  %v506_v13 = vor.u32 1.1754944e-38, %v505_v4  ;;  %v1032_v2 = vpop.permute.xlu1 %298 }
 0x2b5   :  { %vm504_vm14 = vcmp.eq.f32.partialorder %v503_v31, 8.507059e+37 }
 0x2b6   :  { %v193_v52 = vmul.f32 %v192_v51, %v186_v36 }
 0x2b8   :  { %v195_v54 = vsel %vm194_vm5, %v186_v36, %v193_v52  ;;  %v725_v20 = vpop.eup %724  ;;  %v275_v36 = vld [vmem:[%s1134_s3 + $0x8] sm:$0xff]  ;;  %v693_v52 = vld [vmem:[%s1134_s3 + $0x10] sm:$0xff] }
 0x2b9   :  { %v198_v55 = vsel %vm196_vm6, %v197_v53, %v195_v54  ;;  %v495_v21 = vmul.f32 %v725_v20, %v493_v50  ;;  %vm500_vm11 = vweird.f32 %v725_v20  ;;  %v691_v50 = vld [vmem:[%s1133_s2 + $0x10] sm:$0xff] }
 0x2ba   :  { %v199_v56 = vadd.f32 1e-10, %v198_v55  ;;  %vm501_vm13 = vmor %vm499_vm12, %vm500_vm11  ;;  %v695_v55 = vld [vmem:[%s1135_s4 + $0x10] sm:$0xff] }
 0x2bb   :  { %v496_v59 = vsub.f32 1.0, %v495_v21  ;;  %v694_v21 = vld [vmem:[%s1134_s3 + $0x18] sm:$0xff]  ;;  %s784_s3 = smov [#allocation5]  }
 0x2bc   :  { %726 = vrcp.f32 %v199_v56  ;;  %v211_v61 = vand.u32 2147483648, %v199_v56  ;;  %v209_v5 = vand.u32 2147483647, %v199_v56  ;;  %vm205_vm8 = vweird.f32 %v199_v56 }
 0x2bd   :  { %v497_v9 = vmul.f32 %v725_v20, %v496_v59 }
 0x2be   :  { %v212_v7 = vor.u32 1.1754944e-38, %v211_v61  ;;  %vm210_vm10 = vcmp.eq.f32.partialorder %v209_v5, 8.507059e+37 }
 0x2bf   :  { %v498_v19 = vadd.f32 %v725_v20, %v497_v9 }
 0x2c1   :  { %v502_v33 = vsel %vm501_vm13, %v725_v20, %v498_v19 }
 0x2c2   :  { %v727_v57 = vpop.eup %726  ;;  %v507_v14 = vsel %vm504_vm14, %v506_v13, %v502_v33 }
 0x2c3   :  { %v201_v58 = vmul.f32 %v727_v57, %v199_v56  ;;  %vm206_vm7 = vweird.f32 %v727_v57  ;;  %v524_v34 = vperm.slane %v507_v14, 1  ;;  %v511_v35 = vperm.slane %v507_v14, 0 }
 0x2c4   :  { %vm207_vm9 = vmor %vm205_vm8, %vm206_vm7 }
 0x2c5   :  { %v202_v60 = vsub.f32 1.0, %v201_v58  ;;  %v696_v58 = vld [vmem:[%s1135_s4 + $0x18] sm:$0xff]  ;;  %s672_s4 = sshll.u32 %s784_s3, 4  ;;  %s673_s4 = int_to_ptr.vmem [resolvable:$true] %s672_s4 }
 0x2c7   :  { %v203_v0 = vmul.f32 %v727_v57, %v202_v60 }
 0x2c9   :  { %v204_v10 = vadd.f32 %v727_v57, %v203_v0 }
 0x2cb   :  { %v208_v8 = vsel %vm207_vm9, %v727_v57, %v204_v10 }
 0x2cc   :  { %v213_v24 = vsel %vm210_vm10, %v212_v7, %v208_v8 }
 0x2cd   :  { %v229_v6 = vperm.slane %v213_v24, 1  ;;  %v216_v27 = vperm.slane %v213_v24, 0 }
 0x2cf   :  { %234 = vperm.xlu0 %713, %v229_v6   ;;  %227 = vperm.xlu2 %712, %v216_v27  }
 0x2d0   :  { %221 = vperm.xlu1 %711, %v216_v27  }
 0x2d7   :  { %529 = vperm.xlu0 %713, %v524_v34   ;;  %522 = vperm.xlu2 %712, %v511_v35  }
 0x2d8   :  { %714 = vset.pattern.permute.xlu1 %v879_v28 }
 0x2df   :  { %716 = vset.pattern.permute.xlu0 %v783_v32  ;;  %718 = vset.pattern.permute.xlu2 %v783_v32 }
 0x2e0   :  { %240 = vperm.xlu1 %714, %v229_v6   ;;  %283 = vperm.xlu0 %716, %v275_v36  }
 0x2e8   :  { %715 = vset.pattern.permute.xlu1 %v821_v1 }
 0x2f0   :  { %516 = vperm.xlu1 %715, %v511_v35  }
 0x2f8   :  { %717 = vset.pattern.permute.xlu1 %v879_v28  ;;  %v214_v28 = vld [vmem:[%s1133_s2] sm:$0xff] }
 0x300   :  { %535 = vperm.xlu1 %717, %v524_v34  }
 0x308   :  { %719 = vset.pattern.permute.xlu1 %v783_v32 }
 0x329   :  { %v228_v42 = vpop.permute.xlu2 %227 }
 0x32a   :  { %v243_v1 = vmul.f32 %v228_v42, %v215_v41 }
 0x32c   :  { %253 = vperm.xlu1 %719, %v243_v1  }
 0x331   :  { %v523_v16 = vpop.permute.xlu2 %522 }
 0x332   :  { %v538_v49 = vmul.f32 %v692_v47, %v523_v16 }
 0x341   :  { %v235_v43 = vpop.permute.xlu0 %234 }
 0x342   :  { %v222_v32 = vpop.permute.xlu1 %221  ;;  %v244_v44 = vmul.f32 %v235_v43, %v214_v28 }
 0x343   :  { %v242_v23 = vmul.f32 %v222_v32, %v214_v28 }
 0x345   :  { %248 = vperm.xlu2 %718, %v242_v23  }
 0x349   :  { %v530_v54 = vpop.permute.xlu0 %529 }
 0x34a   :  { %v539_v56 = vmul.f32 %v691_v50, %v530_v54 }
 0x34d   :  { %258 = vperm.xlu2 %718, %v244_v44  }
 0x352   :  { %v241_v45 = vpop.permute.xlu1 %240  ;;  %v284_v8 = vpop.permute.xlu0 %283 }
 0x353   :  { %v245_v46 = vmul.f32 %v241_v45, %v215_v41 }
 0x355   :  { %263 = vperm.xlu1 %719, %v245_v46  }
 0x35d   :  { %548 = vperm.xlu1 %719, %v538_v49  }
 0x362   :  { %v517_v51 = vpop.permute.xlu1 %516 }
 0x363   :  { %v537_v53 = vmul.f32 %v691_v50, %v517_v51 }
 0x365   :  { %543 = vperm.xlu2 %718, %v537_v53   ;;  %574 = vperm.xlu1 %719, %v693_v52  }
 0x36d   :  { %553 = vperm.xlu2 %718, %v539_v56   ;;  %595 = vperm.xlu1 %719, %v695_v55  }
 0x372   :  { %v536_v20 = vpop.permute.xlu1 %535 }
 0x373   :  { %v540_v57 = vmul.f32 %v692_v47, %v536_v20 }
 0x375   :  { %579 = vperm.xlu2 %718, %v694_v21   ;;  %558 = vperm.xlu0 %716, %v540_v57  }
 0x37d   :  { %600 = vperm.xlu2 %718, %v696_v58  }
 0x39e   :  { %v254_v61 = vpop.permute.xlu1 %253 }
 0x39f   :  { %v249_v59 = vpop.permute.xlu2 %248  ;;  %v268_v5 = vmul.f32 %v254_v61, %v970_v3  ;;  %v269_v9 = vmul.f32 %v254_v61, %v973_v22 }
 0x3a0   :  { %v266_v19 = vmul.f32 %v249_v59, %v910_v62  ;;  %v267_v6 = vmul.f32 %v249_v59, %v913_v63 }
 0x3a1   :  { %v288_v24 = vadd.f32 %v284_v8, %v268_v5  ;;  %v289_v4 = vadd.f32 %v284_v8, %v269_v9 }
 0x3a2   :  { %v1059_v27 = vadd.f32 %v279_v37, %v266_v19  ;;  %v1067_v34 = vadd.f32 %v279_v37, %v267_v6 }
 0x3a3   :  { %v308_v13 = vmul.f32 %v1027_v40, %v288_v24  ;;  %v309_v3 = vmul.f32 %v1027_v40, %v289_v4 }
 0x3a4   :  { %v306_v62 = vmul.f32 %v1032_v2, %v1059_v27  ;;  %v307_v36 = vmul.f32 %v1032_v2, %v1067_v34 }
 0x3a5   :  { %vm316_vm15 = vcmp.ge.f32.partialorder %v308_v13, 0.0  ;;  %vm317_vm0 = vcmp.ge.f32.partialorder %v309_v3, 0.0 }
 0x3a6   :  { %vm314_vm1 = vcmp.ge.f32.partialorder %v306_v62, 0.0  ;;  %v324_v1 = vsel %vm316_vm15, %v288_v24, 0.0  ;;  %v325_v28 = vsel %vm317_vm0, %v289_v4, 0.0  ;;  %vm315_vm2 = vcmp.ge.f32.partialorder %v307_v36, 0.0 }
 0x3a7   :  { %v259_v60 = vpop.permute.xlu2 %258  ;;  %v322_v23 = vsel %vm314_vm1, %v1059_v27, 0.0  ;;  %v332_v45 = vsub.f32 %v288_v24, %v324_v1  ;;  %v333_v46 = vsub.f32 %v289_v4, %v325_v28 }
 0x3a8   :  { %v270_v31 = vmul.f32 %v259_v60, %v956_v12  ;;  %v271_v33 = vmul.f32 %v259_v60, %v959_v39  ;;  %v330_v60 = vsub.f32 %v1059_v27, %v322_v23 }
 0x3aa   :  { %v1071_v35 = vadd.f32 %v279_v37, %v270_v31  ;;  %v1073_v63 = vadd.f32 %v279_v37, %v271_v33 }
 0x3ac   :  { %v310_v41 = vmul.f32 %v1032_v2, %v1071_v35  ;;  %v311_v42 = vmul.f32 %v1032_v2, %v1073_v63 }
 0x3ae   :  { %vm318_vm3 = vcmp.ge.f32.partialorder %v310_v41, 0.0  ;;  %vm319_vm4 = vcmp.ge.f32.partialorder %v311_v42, 0.0 }
 0x3bf   :  { %v544_v0 = vpop.permute.xlu2 %543 }
 0x3c0   :  { %v561_v16 = vmul.f32 %v544_v0, %v920_v17  ;;  %v562_v49 = vmul.f32 %v544_v0, %v923_v18 }
 0x3c7   :  { %v264_v10 = vpop.permute.xlu1 %263  ;;  %v554_v7 = vpop.permute.xlu2 %553 }
 0x3c8   :  { %v272_v43 = vmul.f32 %v264_v10, %v980_v48  ;;  %v273_v44 = vmul.f32 %v264_v10, %v983_v15  ;;  %v565_v50 = vmul.f32 %v554_v7, %v950_v38  ;;  %v566_v51 = vmul.f32 %v554_v7, %v953_v11 }
 0x3c9   :  { %v323_v38 = vsel %vm315_vm2, %v1067_v34, 0.0  ;;  %v326_v10 = vsel %vm318_vm3, %v1071_v35, 0.0  ;;  %v327_v7 = vsel %vm319_vm4, %v1073_v63, 0.0 }
 0x3ca   :  { %v1096_v48 = vadd.f32 %v284_v8, %v272_v43  ;;  %v1098_v15 = vadd.f32 %v284_v8, %v273_v44  ;;  %v331_v62 = vsub.f32 %v1067_v34, %v323_v38  ;;  %v334_v36 = vsub.f32 %v1071_v35, %v326_v10 }
 0x3cb   :  { %v335_v41 = vsub.f32 %v1073_v63, %v327_v7 }
 0x3cc   :  { %v312_v8 = vmul.f32 %v1027_v40, %v1096_v48  ;;  %v313_v19 = vmul.f32 %v1027_v40, %v1098_v15 }
 0x3ce   :  { %vm320_vm11 = vcmp.ge.f32.partialorder %v312_v8, 0.0  ;;  %vm321_vm12 = vcmp.ge.f32.partialorder %v313_v19, 0.0 }
 0x3cf   :  { %v549_v22 = vpop.permute.xlu1 %548  ;;  %v1065_v14 = vpop.permute.xlu2 %579  ;;  %v328_v63 = vsel %vm320_vm11, %v1096_v48, 0.0  ;;  %v329_v43 = vsel %vm321_vm12, %v1098_v15, 0.0 }
 0x3d0   :  { %v563_v12 = vmul.f32 %v549_v22, %v930_v25  ;;  %v564_v39 = vmul.f32 %v549_v22, %v933_v26 }
 0x3d2   :  { %v584_v37 = vadd.f32 %v1065_v14, %v563_v12  ;;  %v585_v25 = vadd.f32 %v1065_v14, %v564_v39 }
 0x3d7   :  { %v575_v32 = vpop.permute.xlu1 %574  ;;  %v1085_v26 = vpop.permute.xlu2 %600 }
 0x3d8   :  { %v605_v2 = vmul.f32 %v1085_v26, %v584_v37  ;;  %v606_v47 = vmul.f32 %v1085_v26, %v585_v25  ;;  %v582_v21 = vadd.f32 %v575_v32, %v561_v16  ;;  %v583_v17 = vadd.f32 %v575_v32, %v562_v49 }
 0x3d9   :  { %v586_v57 = vadd.f32 %v575_v32, %v565_v50  ;;  %v587_v18 = vadd.f32 %v575_v32, %v566_v51 }
 0x3da   :  { %vm613_vm5 = vcmp.ge.f32.partialorder %v605_v2, 0.0  ;;  %vm614_vm6 = vcmp.ge.f32.partialorder %v606_v47, 0.0 }
 0x3db   :  { %v621_v52 = vsel %vm613_vm5, %v584_v37, 0.0  ;;  %v622_v53 = vsel %vm614_vm6, %v585_v25, 0.0 }
 0x3dc   :  { %v629_v54 = vsub.f32 %v584_v37, %v621_v52  ;;  %v630_v55 = vsub.f32 %v585_v25, %v622_v53  ;;  %v653_v56 = vadd.f32 %v621_v52, %v332_v45  ;;  %v654_v20 = vadd.f32 %v622_v53, %v333_v46 }
 0x3dd   :  { %v337_v45 = vsub.f32 %v1098_v15, %v329_v43 }
 0x3de   :  { %v637_v11 = vadd.f32 %v629_v54, %v324_v1  ;;  %v638_v58 = vadd.f32 %v630_v55, %v325_v28  ;;  %662 = vst [vmem:[#allocation5 + $0x30] sm:$0xff] %v653_v56 }
 0x3df   :  { %v596_v59 = vpop.permute.xlu1 %595  ;;  %663 = vst [vmem:[#allocation5 + $0x38] sm:$0xff] %v654_v20 }
 0x3e0   :  { %v603_v61 = vmul.f32 %v596_v59, %v582_v21  ;;  %v604_v0 = vmul.f32 %v596_v59, %v583_v17  ;;  %v607_v5 = vmul.f32 %v596_v59, %v586_v57  ;;  %v608_v9 = vmul.f32 %v596_v59, %v587_v18  ;;  %645 = vst [vmem:[#allocation5 + $0x10] sm:$0xff] %v637_v11 }
 0x3e1   :  { %646 = vst [vmem:[#allocation5 + $0x18] sm:$0xff] %v638_v58 }
 0x3e2   :  { %vm611_vm7 = vcmp.ge.f32.partialorder %v603_v61, 0.0  ;;  %vm612_vm8 = vcmp.ge.f32.partialorder %v604_v0, 0.0  ;;  %vm615_vm9 = vcmp.ge.f32.partialorder %v607_v5, 0.0  ;;  %vm616_vm10 = vcmp.ge.f32.partialorder %v608_v9, 0.0 }
 0x3e3   :  { %v619_v24 = vsel %vm611_vm7, %v582_v21, 0.0  ;;  %v620_v4 = vsel %vm612_vm8, %v583_v17, 0.0  ;;  %v623_v6 = vsel %vm615_vm9, %v586_v57, 0.0  ;;  %v624_v27 = vsel %vm616_vm10, %v587_v18, 0.0 }
 0x3e4   :  { %v627_v31 = vsub.f32 %v582_v21, %v619_v24  ;;  %v628_v33 = vsub.f32 %v583_v17, %v620_v4  ;;  %v631_v13 = vsub.f32 %v586_v57, %v623_v6  ;;  %v632_v3 = vsub.f32 %v587_v18, %v624_v27 }
 0x3e5   :  { %v651_v22 = vadd.f32 %v619_v24, %v330_v60  ;;  %v652_v28 = vadd.f32 %v620_v4, %v331_v62  ;;  %v655_v34 = vadd.f32 %v623_v6, %v334_v36  ;;  %v656_v32 = vadd.f32 %v624_v27, %v335_v41 }
 0x3e6   :  { %v635_v12 = vadd.f32 %v627_v31, %v322_v23  ;;  %v636_v39 = vadd.f32 %v628_v33, %v323_v38  ;;  %v639_v40 = vadd.f32 %v631_v13, %v326_v10  ;;  %v640_v42 = vadd.f32 %v632_v3, %v327_v7 }
 0x3e7   :  { %660 = vst [vmem:[#allocation5 + $0x20] sm:$0xff] %v651_v22  ;;  %v559_v1 = vpop.permute.xlu0 %558 }
 0x3e8   :  { %643 = vst [vmem:[#allocation5] sm:$0xff] %v635_v12  ;;  %v567_v37 = vmul.f32 %v559_v1, %v940_v29  ;;  %v568_v25 = vmul.f32 %v559_v1, %v943_v30  ;;  %v336_v30 = vsub.f32 %v1096_v48, %v328_v63 }
 0x3e9   :  { %644 = vst [vmem:[#allocation5 + $0x8] sm:$0xff] %v636_v39 }
 0x3ea   :  { %647 = vst [vmem:[#allocation5 + $0x40] sm:$0xff] %v639_v40  ;;  %v588_v23 = vadd.f32 %v1065_v14, %v567_v37  ;;  %v589_v35 = vadd.f32 %v1065_v14, %v568_v25 }
 0x3eb   :  { %648 = vst [vmem:[#allocation5 + $0x48] sm:$0xff] %v640_v42 }
 0x3ec   :  { %661 = vst [vmem:[#allocation5 + $0x28] sm:$0xff] %v652_v28  ;;  %v609_v44 = vmul.f32 %v1085_v26, %v588_v23  ;;  %v610_v29 = vmul.f32 %v1085_v26, %v589_v35 }
 0x3ed   :  { %664 = vst [vmem:[#allocation5 + $0x60] sm:$0xff] %v655_v34 }
 0x3ee   :  { %665 = vst [vmem:[#allocation5 + $0x68] sm:$0xff] %v656_v32  ;;  %vm617_vm13 = vcmp.ge.f32.partialorder %v609_v44, 0.0  ;;  %vm618_vm14 = vcmp.ge.f32.partialorder %v610_v29, 0.0 }
 0x3ef   :  { %v625_v14 = vsel %vm617_vm13, %v588_v23, 0.0  ;;  %v626_v46 = vsel %vm618_vm14, %v589_v35, 0.0 }
 0x3f0   :  { %v633_v2 = vsub.f32 %v588_v23, %v625_v14  ;;  %v634_v47 = vsub.f32 %v589_v35, %v626_v46  ;;  %v657_v16 = vadd.f32 %v625_v14, %v336_v30  ;;  %v658_v49 = vadd.f32 %v626_v46, %v337_v45 }
 0x3f2   :  { %v641_v26 = vadd.f32 %v633_v2, %v328_v63  ;;  %v642_v50 = vadd.f32 %v634_v47, %v329_v43  ;;  %666 = vst [vmem:[#allocation5 + $0x70] sm:$0xff] %v657_v16 }
 0x3f3   :  { %667 = vst [vmem:[#allocation5 + $0x78] sm:$0xff] %v658_v49 }
 0x3f4   :  { %649 = vst [vmem:[#allocation5 + $0x50] sm:$0xff] %v641_v26 }
 0x3f5   :  { %650 = vst [vmem:[#allocation5 + $0x58] sm:$0xff] %v642_v50 }
 0x3f6   :  { %680 = dma.vmem_to_hbm [thread:$0]  %s673_s4, 2048, %s675_s1, [#allocation4], %s781_s23, %s781_s23, %s782_s24  }
 0x3f7   :  { %778 = dma.done.wait [#allocation4], 2048  }
 0x3f8   :  { %779 = vsyncadd [#allocation4], 4294965248 }
 0x3f9   :  { %685 = vsyncpa [#allocation3], 1 }
 0x3fa   :  { %686 = vsyncpa [#allocation4], 1 }

</bundles_post_ra>
